<compile_context>
chip_gen: v7x
topology: tpu7x:2x2x1
jax: 0.10.0
libtpu: 0.0.40
codegen_flags: <defaults>
</compile_context>

<pallas_src>
import functools
import math

import jax
import jax.numpy as jnp
from jax.experimental import pallas as pl
from jax.experimental.pallas import tpu as pltpu


def _round_up(x, m):
    return ((x + m - 1) // m) * m


def _default_tile_config():
    """Per-generation tile / VMEM budget.

    v7x has only 64 MiB VMEM per TensorCore -> stay conservative (default
    tiles use ~3-4 MiB with double buffering and the f32 accumulator).
    v5e/v6e have 128 MiB -> bigger K/N tiles amortize the ~0.35us per-grid-step
    overhead and give longer unmasked lane-dense stores.
    """
    vmem_cap = 64 * 1024 * 1024  # conservative default (v7x-sized)
    try:
        vmem_cap = int(getattr(pltpu.get_tpu_info(), "vmem_capacity_bytes",
                               vmem_cap))
    except Exception:
        pass
    if vmem_cap >= 128 * 1024 * 1024:  # v5e / v6e
        return dict(tile_m=256, tile_n=1024, tile_k=1024,
                    vmem_limit=64 * 1024 * 1024)
    # v7x (64 MiB per TC)
    return dict(tile_m=256, tile_n=512, tile_k=512,
                vmem_limit=32 * 1024 * 1024)


# --------------------------------------------------------------------------
# Single-step kernel: xh = LeakyReLU(hidden @ W)
# --------------------------------------------------------------------------
def _drnn_kernel(h_ref, w_ref, o_ref, acc_ref, *, alpha):
    # Grid = (M tiles, N tiles, K tiles).  K is last ("arbitrary") so the f32
    # accumulator stays resident in VMEM across the reduction.
    @pl.when(pl.program_id(2) == 0)
    def _init():
        acc_ref[...] = jnp.zeros_like(acc_ref)

    acc_ref[...] += jnp.dot(
        h_ref[...], w_ref[...], preferred_element_type=jnp.float32
    )

    @pl.when(pl.program_id(2) == pl.num_programs(2) - 1)
    def _finalize():
        xh = acc_ref[...]
        # LeakyReLU(alpha), 0 <= alpha <= 1: a single vmax on the VPU, in f32.
        xh = jnp.maximum(xh, alpha * xh)
        o_ref[...] = xh.astype(o_ref.dtype)


def drnn_forward(hidden, W, *, input_dim, hidden_dim, alpha=0.2,
                 compute_dtype=jnp.bfloat16,
                 tile_m=None, tile_n=None, tile_k=None,
                 vmem_limit_bytes=None):
    """Pallas TPU forward: (x, h) = split(LeakyReLU(hidden @ W), [in, hid])."""
    batch = hidden.shape[0]
    total = input_dim + hidden_dim
    assert hidden.shape == (batch, hidden_dim)
    assert W.shape == (hidden_dim, total)
    # maximum(x, alpha*x) == LeakyReLU only for slopes in [0, 1].
    assert 0.0 <= alpha <= 1.0, "LeakyReLU slope must be in [0, 1]"

    out_dtype = hidden.dtype
    if compute_dtype is None:
        compute_dtype = hidden.dtype
    # NOTE: persist W in compute_dtype at parameter init for recurrent use —
    # these casts are no-ops when the caller already did so.
    if hidden.dtype != compute_dtype:
        hidden = hidden.astype(compute_dtype)
    if W.dtype != compute_dtype:
        W = W.astype(compute_dtype)

    cfg = _default_tile_config()
    tile_m = tile_m or cfg["tile_m"]
    tile_n = tile_n or cfg["tile_n"]
    tile_k = tile_k or cfg["tile_k"]
    vmem_limit_bytes = vmem_limit_bytes or cfg["vmem_limit"]

    # Tile sizes: always (8, 128)-aligned, never full-extent fallbacks.
    m_req = _round_up(batch, 8)
    n_req = _round_up(total, 128)
    k_req = _round_up(hidden_dim, 128)
    tm = min(tile_m, m_req)
    tn = min(tile_n, n_req)
    tk = min(tile_k, k_req)

    # v7x megacore: make sure there are >= 2 "parallel" tiles when shapes
    # allow, so the two TensorCores can both be used.
    if (pl.cdiv(m_req, tm) * pl.cdiv(n_req, tn)) < 2:
        if n_req >= 256:
            tn = _round_up(pl.cdiv(n_req, 2), 128)
        elif m_req >= 16:
            tm = _round_up(pl.cdiv(m_req, 2), 8)

    # Pad to tile multiples.  Zero-padding K is exact for the matmul; padded
    # M/N rows/cols are sliced off below.
    m_pad = _round_up(batch, tm)
    n_pad = _round_up(total, tn)
    k_pad = _round_up(hidden_dim, tk)
    if (m_pad, k_pad) != hidden.shape:
        hidden = jnp.pad(hidden, ((0, m_pad - batch), (0, k_pad - hidden_dim)))
    if (k_pad, n_pad) != W.shape:
        W = jnp.pad(W, ((0, k_pad - hidden_dim), (0, n_pad - total)))

    grid = (m_pad // tm, n_pad // tn, k_pad // tk)
    kernel = functools.partial(_drnn_kernel, alpha=alpha)

    in_item = jnp.dtype(compute_dtype).itemsize
    out_item = jnp.dtype(out_dtype).itemsize
    cost = pl.CostEstimate(
        flops=2 * m_pad * k_pad * n_pad,
        transcendentals=0,
        bytes_accessed=(m_pad * k_pad + k_pad * n_pad) * in_item
        + m_pad * n_pad * out_item,
    )

    xh = pl.pallas_call(
        kernel,
        out_shape=jax.ShapeDtypeStruct((m_pad, n_pad), out_dtype),
        grid_spec=pltpu.PrefetchScalarGridSpec(
            num_scalar_prefetch=0,
            grid=grid,
            in_specs=[
                # hidden tile: depends on (batch tile i, K tile k).
                pl.BlockSpec((tm, tk), lambda i, j, k: (i, k)),
                # W tile: re-fetched per (j, k) step; the full W is streamed
                # once per batch tile i, so larger tm reduces W HBM traffic
                # in the large-batch regime.
                pl.BlockSpec((tk, tn), lambda i, j, k: (k, j)),
            ],
            out_specs=pl.BlockSpec((tm, tn), lambda i, j, k: (i, j)),
            scratch_shapes=[pltpu.VMEM((tm, tn), jnp.float32)],
        ),
        compiler_params=pltpu.CompilerParams(
            dimension_semantics=("parallel", "parallel", "arbitrary"),
            vmem_limit_bytes=vmem_limit_bytes,
        ),
        cost_estimate=cost,
    )(hidden, W)

    # Lane-misaligned split done as an XLA slice, not inside the kernel.
    # TODO(synk): when input_dim and hidden_dim are both 128-multiples, emit
    # x and h as two lane-aligned kernel outputs instead of slicing here.
    x = xh[:batch, :input_dim]
    h = xh[:batch, input_dim:total]
    return x, h


# --------------------------------------------------------------------------
# Multi-step resident-W kernel for the recurrent use case: W is loaded into
# VMEM once, the hidden state lives in a VMEM scratch, and the time loop is
# the (sequential) grid.
# --------------------------------------------------------------------------
def _drnn_scan_kernel(h0_ref, w_ref, x_ref, h_out_ref, h_state_ref, *,
                      alpha, input_dim):
    @pl.when(pl.program_id(0) == 0)
    def _init():
        h_state_ref[...] = h0_ref[...].astype(h_state_ref.dtype)

    xh = jnp.dot(h_state_ref[...], w_ref[...],
                 preferred_element_type=jnp.float32)
    xh = jnp.maximum(xh, alpha * xh)           # LeakyReLU, single vmax
    x_ref[0] = xh[:, :input_dim].astype(x_ref.dtype)
    new_h = xh[:, input_dim:]
    h_state_ref[...] = new_h.astype(h_state_ref.dtype)
    h_out_ref[...] = new_h.astype(h_out_ref.dtype)


def drnn_scan_forward(hidden, W, *, input_dim, hidden_dim, num_steps,
                      alpha=0.2, compute_dtype=None,
                      vmem_limit_bytes=32 * 1024 * 1024):
    """Run `num_steps` recurrent applications of the module with W resident
    in VMEM.  Returns (x_per_step[T, B, input_dim], final_hidden[B, hidden])."""
    batch = hidden.shape[0]
    total = input_dim + hidden_dim
    assert hidden.shape == (batch, hidden_dim)
    assert W.shape == (hidden_dim, total)
    assert 0.0 <= alpha <= 1.0, "LeakyReLU slope must be in [0, 1]"
    assert num_steps >= 1

    out_dtype = hidden.dtype
    if compute_dtype is None:
        compute_dtype = hidden.dtype
    hidden_c = hidden.astype(compute_dtype)
    W_c = W.astype(compute_dtype)

    itemsize = jnp.dtype(compute_dtype).itemsize
    w_bytes = hidden_dim * total * itemsize
    # Resident-W kernel: W + state + per-step tiles must fit in VMEM.
    # TODO(synk): tile W over N inside the step if this ever trips.
    assert w_bytes <= 24 * 1024 * 1024, "W too large for resident-W scan"

    kernel = functools.partial(_drnn_scan_kernel, alpha=alpha,
                               input_dim=input_dim)
    cost = pl.CostEstimate(
        flops=2 * num_steps * batch * hidden_dim * total,
        transcendentals=0,
        bytes_accessed=(batch * hidden_dim + hidden_dim * total) * itemsize
        + (num_steps * batch * input_dim + batch * hidden_dim)
        * jnp.dtype(out_dtype).itemsize,
    )

    xs, h_final = pl.pallas_call(
        kernel,
        out_shape=(
            jax.ShapeDtypeStruct((num_steps, batch, input_dim), out_dtype),
            jax.ShapeDtypeStruct((batch, hidden_dim), out_dtype),
        ),
        grid_spec=pltpu.PrefetchScalarGridSpec(
            num_scalar_prefetch=0,
            grid=(num_steps,),
            in_specs=[
                # Initial hidden: same block every step -> fetched once.
                pl.BlockSpec((batch, hidden_dim), lambda t: (0, 0)),
                # W: same block every step -> one HBM->VMEM DMA for the whole
                # scan (this is the big bandwidth win vs. one call per step).
                pl.BlockSpec((hidden_dim, total), lambda t: (0, 0)),
            ],
            out_specs=[
                pl.BlockSpec((1, batch, input_dim), lambda t: (t, 0, 0)),
                # Final hidden: resident output, written back once at the end.
                pl.BlockSpec((batch, hidden_dim), lambda t: (0, 0)),
            ],
            scratch_shapes=[pltpu.VMEM((batch, hidden_dim), compute_dtype)],
        ),
        compiler_params=pltpu.CompilerParams(
            dimension_semantics=("arbitrary",),  # true sequential recurrence
            vmem_limit_bytes=vmem_limit_bytes,
        ),
        cost_estimate=cost,
    )(hidden_c, W_c)
    return xs, h_final


if __name__ == "__main__":
    input_dim = 16
    hidden_dim = 32
    batch = 8
    alpha = 0.2

    key = jax.random.PRNGKey(0)
    k_w, k_h = jax.random.split(key)

    # Matches reset_parameters(): uniform(-stdv, stdv), stdv = 1/sqrt(hidden_dim)
    stdv = 1.0 / math.sqrt(hidden_dim)
    W = jax.random.uniform(
        k_w, (hidden_dim, input_dim + hidden_dim),
        minval=-stdv, maxval=stdv, dtype=jnp.float32,
    )
    hidden = jax.random.normal(k_h, (batch, hidden_dim), dtype=jnp.float32)

    # JAX reference (same math as the PyTorch forward).
    xh_ref = jnp.matmul(hidden, W)
    xh_ref = jnp.where(xh_ref >= 0, xh_ref, alpha * xh_ref)
    x_ref, h_ref = xh_ref[:, :input_dim], xh_ref[:, input_dim:]

    # --- single step, f32 compute (tight check) ---
    x, h = drnn_forward(hidden, W, input_dim=input_dim, hidden_dim=hidden_dim,
                        alpha=alpha, compute_dtype=jnp.float32)
    jax.block_until_ready((x, h))
    assert x.shape == (batch, input_dim) and h.shape == (batch, hidden_dim)
    assert jnp.allclose(x, x_ref, atol=1e-5, rtol=1e-5)
    assert jnp.allclose(h, h_ref, atol=1e-5, rtol=1e-5)

    # --- single step, default bf16 MXU path with pre-cast (persisted) weights ---
    W_bf16 = W.astype(jnp.bfloat16)            # cast once at "init", not per call
    hidden_bf16 = hidden.astype(jnp.bfloat16)
    x_b, h_b = drnn_forward(hidden_bf16, W_bf16, input_dim=input_dim,
                            hidden_dim=hidden_dim, alpha=alpha)
    jax.block_until_ready((x_b, h_b))
    assert jnp.allclose(x_b.astype(jnp.float32), x_ref, atol=5e-2, rtol=5e-2)
    assert jnp.allclose(h_b.astype(jnp.float32), h_ref, atol=5e-2, rtol=5e-2)

    # --- multi-step resident-W scan (f32 compute, tight check) ---
    T = 4
    xs, h_final = drnn_scan_forward(hidden, W, input_dim=input_dim,
                                    hidden_dim=hidden_dim, num_steps=T,
                                    alpha=alpha, compute_dtype=jnp.float32)
    jax.block_until_ready((xs, h_final))
    h_cur = hidden
    for t in range(T):
        xh_t = jnp.matmul(h_cur, W)
        xh_t = jnp.where(xh_t >= 0, xh_t, alpha * xh_t)
        x_t, h_cur = xh_t[:, :input_dim], xh_t[:, input_dim:]
        assert jnp.allclose(xs[t], x_t, atol=1e-5, rtol=1e-5)
    assert jnp.allclose(h_final, h_cur, atol=1e-5, rtol=1e-5)

    print("KERNEL_OK")
</pallas_src>

<mosaic_0001>
module attributes {stable_mosaic.version = 11 : i64} {
  func.func @_drnn_kernel(%arg0: i32, %arg1: i32, %arg2: i32, %arg3: memref<8x128xf32, #tpu.memory_space<vmem>>, %arg4: memref<128x128xf32, #tpu.memory_space<vmem>>, %arg5: memref<8x128xf32, #tpu.memory_space<vmem>>, %arg6: memref<8x128xf32, #tpu.memory_space<vmem>>) attributes {dimension_semantics = [#tpu.dimension_semantics<parallel>, #tpu.dimension_semantics<parallel>, #tpu.dimension_semantics<arbitrary>], iteration_bounds = array<i64: 1, 1, 1>, scalar_prefetch = 0 : i64, scratch_operands = 1 : i64, tpu.core_type = #tpu.core_type<tc>, window_params = [{transform_indices = @transform_0, window_bounds = array<i64: 8, 128>}, {transform_indices = @transform_1, window_bounds = array<i64: 128, 128>}, {transform_indices = @transform_2, window_bounds = array<i64: 8, 128>}]} {
    %c0_i32 = arith.constant 0 : i32
    %0 = arith.cmpi eq, %arg2, %c0_i32 : i32
    %1 = arith.extui %0 : i1 to i32
    %c0_i32_0 = arith.constant 0 : i32
    %2 = arith.cmpi ne, %1, %c0_i32_0 : i32
    scf.if %2 {
      %cst_10 = arith.constant 0.000000e+00 : f32
      %12 = vector.broadcast %cst_10 : f32 to vector<8x128xf32>
      %c0_11 = arith.constant 0 : index
      %c0_12 = arith.constant 0 : index
      %13 = vector.load %arg6[%c0_11, %c0_12] : memref<8x128xf32, #tpu.memory_space<vmem>>, vector<8x128xf32>
      tpu.vector_store %arg6[%c0_11, %c0_12], %12 {strides = array<i32>} : memref<8x128xf32, #tpu.memory_space<vmem>>, vector<8x128xf32>,
    } else {
    }
    %c0 = arith.constant 0 : index
    %c0_1 = arith.constant 0 : index
    %3 = vector.load %arg6[%c0, %c0_1] : memref<8x128xf32, #tpu.memory_space<vmem>>, vector<8x128xf32>
    %c0_2 = arith.constant 0 : index
    %c0_3 = arith.constant 0 : index
    %4 = vector.load %arg3[%c0_2, %c0_3] : memref<8x128xf32, #tpu.memory_space<vmem>>, vector<8x128xf32>
    %c0_4 = arith.constant 0 : index
    %c0_5 = arith.constant 0 : index
    %5 = vector.load %arg4[%c0_4, %c0_5] : memref<128x128xf32, #tpu.memory_space<vmem>>, vector<128x128xf32>
    %cst = arith.constant dense<0.000000e+00> : vector<8x128xf32>
    %6 = tpu.matmul %4, %5, %cst {dimension_numbers = #tpu.dot_dimension_numbers<[1], [0], [0], [1], [0, 0, 1, 1], [], []>} : vector<8x128xf32>, vector<128x128xf32>, vector<8x128xf32> -> vector<8x128xf32>
    %7 = arith.addf %3, %6 : vector<8x128xf32>
    %c0_6 = arith.constant 0 : index
    %c0_7 = arith.constant 0 : index
    %8 = vector.load %arg6[%c0_6, %c0_7] : memref<8x128xf32, #tpu.memory_space<vmem>>, vector<8x128xf32>
    tpu.vector_store %arg6[%c0_6, %c0_7], %7 {strides = array<i32>} : memref<8x128xf32, #tpu.memory_space<vmem>>, vector<8x128xf32>,
    %c0_i32_8 = arith.constant 0 : i32
    %9 = arith.cmpi eq, %arg2, %c0_i32_8 : i32
    %10 = arith.extui %9 : i1 to i32
    %c0_i32_9 = arith.constant 0 : i32
    %11 = arith.cmpi ne, %10, %c0_i32_9 : i32
    scf.if %11 {
      %c0_10 = arith.constant 0 : index
      %c0_11 = arith.constant 0 : index
      %12 = vector.load %arg6[%c0_10, %c0_11] : memref<8x128xf32, #tpu.memory_space<vmem>>, vector<8x128xf32>
      %cst_12 = arith.constant 2.000000e-01 : f32
      %13 = vector.broadcast %cst_12 : f32 to vector<8x128xf32>
      %14 = arith.mulf %13, %12 : vector<8x128xf32>
      %15 = arith.maximumf %12, %14 : vector<8x128xf32>
      %c0_13 = arith.constant 0 : index
      %c0_14 = arith.constant 0 : index
      %16 = vector.load %arg5[%c0_13, %c0_14] : memref<8x128xf32, #tpu.memory_space<vmem>>, vector<8x128xf32>
      tpu.vector_store %arg5[%c0_13, %c0_14], %15 {strides = array<i32>} : memref<8x128xf32, #tpu.memory_space<vmem>>, vector<8x128xf32>,
    } else {
    }
    return
  }
  func.func @transform_0(%arg0: i32, %arg1: i32, %arg2: i32) -> (i32, i32) {
    %c0_i32 = arith.constant 0 : i32
    return %arg0, %arg2 : i32, i32
  }
  func.func @transform_1(%arg0: i32, %arg1: i32, %arg2: i32) -> (i32, i32) {
    %c0_i32 = arith.constant 0 : i32
    return %arg2, %arg1 : i32, i32
  }
  func.func @transform_2(%arg0: i32, %arg1: i32, %arg2: i32) -> (i32, i32) {
    %c0_i32 = arith.constant 0 : i32
    return %arg0, %arg1 : i32, i32
  }
}

</mosaic_0001>

<bundles_post_ra>
// kernel: tpu_custom_call.1
= control target key start
LH: loop header
LB: loop body
LE: loop exit
PB: predicated region body
PF: predicated region fallthrough
CT: control target
= control target key end

     0   :  { %7 = vsyncpa [#allocation4], 0  ;;  %s378_s0 = inlined_call_operand.hbm [shape: f32[8,128], index: 0, kind: input, shape index: {}]   ;;  %s379_s1 = inlined_call_operand.hbm [shape: f32[128,128], index: 1, kind: input, shape index: {}]   ;;  %s380_s2 = inlined_call_operand.hbm [shape: f32[8,128], index: 2, kind: output, shape index: {}]  }
   0x1   :  { %8 = vsyncpa [#allocation7], 0 }
   0x2   :  { %9 = vsyncpa [#allocation5], 0  ;;  %s312_s9 = smov [#allocation3]   ;;  %s313_s11 = smov [#allocation6]  }
   0x3   :  { %s16_s10 = sshll.u32 %s312_s9, 4  ;;  %s25_s12 = sshll.u32 %s313_s11, 4  ;;  %s17_s10 = int_to_ptr.vmem [resolvable:$true] %s16_s10  ;;  %s335_s12 = int_to_ptr.vmem [resolvable:$true] %s25_s12 }
   0x4   :  { %s240_s15 = scalar_lea.hbm %s378_s0, 128 }
   0x5   :  { %p241_p0 = scmp.ne.s32.totalorder %s378_s0, %s240_s15  ;;  %p244_p1 = scmp.lt.u32.totalorder %s240_s15, %s378_s0 }
   0x7   :  { %p246_p2 = pnand %p244_p1, %p241_p0 }
   0x9   :  { %249 = shalt.err (!%p246_p2)
}
   0xa   :  { %s250_s20 = scalar_lea.vmem %s17_s10, 128  ;;  %p255_p4 = scmp.lt.s32.totalorder %s17_s10, %s17_s10 }
   0xb   :  { %p251_p3 = scmp.ne.s32.totalorder %s17_s10, %s250_s20  ;;  %p256_p5 = scmp.lt.s32.totalorder %s250_s20, %s250_s20 }
   0xd   :  { %p257_p6 = por %p256_p5, %p255_p4 }
   0xf   :  { %p258_p7 = pnand %p257_p6, %p251_p3 }
  0x11   :  { %261 = shalt.err (!%p258_p7)
}
  0x12   :  { %19 = dma.hbm_to_vmem [thread:$0]  %s378_s0, 128, %s17_s10, [#allocation4]  }
  0x13   :  { %s262_s25 = scalar_lea.hbm %s379_s1, 2048 }
  0x14   :  { %p263_p8 = scmp.ne.s32.totalorder %s379_s1, %s262_s25  ;;  %p266_p9 = scmp.lt.u32.totalorder %s262_s25, %s379_s1 }
  0x16   :  { %p268_p10 = pnand %p266_p9, %p263_p8 }
  0x18   :  { %271 = shalt.err (!%p268_p10)
}
  0x19   :  { %s272_s30 = scalar_lea.vmem %s335_s12, 2048  ;;  %p277_p12 = scmp.lt.s32.totalorder %s335_s12, %s335_s12 }
  0x1a   :  { %p273_p11 = scmp.ne.s32.totalorder %s335_s12, %s272_s30  ;;  %p278_p13 = scmp.lt.s32.totalorder %s272_s30, %s272_s30 }
  0x1c   :  { %p279_p0 = por %p278_p13, %p277_p12 }
  0x1e   :  { %p280_p1 = pnand %p279_p0, %p273_p11 }
  0x20   :  { %283 = shalt.err (!%p280_p1)
}
  0x21   :  { %s314_s0 = smov 128   ;;  %s315_s3 = smov 8  }
  0x22   :  { %31 = dma.hbm_to_vmem [thread:$0]  %s379_s1, 2048, %s335_s12, [#allocation7], %s314_s0, %s314_s0, %s315_s3  }
  0x23   :  { %306 = dma.done.wait [#allocation4], 128  }
  0x24   :  { %307 = vsyncadd [#allocation4], 4294967168 }
  0x25   :  { %308 = dma.done.wait [#allocation7], 2048  }
  0x26   :  { %309 = vsyncadd [#allocation7], 4294965248  ;;  %v316_v0 = vmov 0.0|0.0   ;;  %vm317_vm0 = vmmov 0   ;;  %v318_v1 = vmov 0.0   ;;  %v45_v2 = vld [vmem:[#allocation6] sm:$0xff] }
  0x27   :  { %208 = vmatprep.subr.bf16.mxu0 %v316_v0  ;;  %205 = vmatprep.mubr.msk.f32.mxu0 %vm317_vm0, %v318_v1  ;;  %v46_v3 = vld [vmem:[#allocation6 + $0x8] sm:$0xff]  ;;  %v47_v4 = vld [vmem:[#allocation6 + $0x10] sm:$0xff]  ;;  %v48_v6 = vld [vmem:[#allocation6 + $0x18] sm:$0xff]  ;;  %s319_s1 = smov [#allocation8]  }
  0x28   :  { %v209_v5 = vpack.c.bf16 %v46_v3, %v45_v2  ;;  %v212_v7 = vpack.c.bf16 %v48_v6, %v47_v4  ;;  %v49_v8 = vld [vmem:[#allocation6 + $0x20] sm:$0xff]  ;;  %v50_v9 = vld [vmem:[#allocation6 + $0x28] sm:$0xff]  ;;  %v51_v11 = vld [vmem:[#allocation6 + $0x30] sm:$0xff]  ;;  %s146_s6 = sshll.u32 %s319_s1, 4  ;;  %s147_s6 = int_to_ptr.vmem [resolvable:$true] %s146_s6 }
  0x29   :  { %v215_v10 = vpack.c.bf16 %v50_v9, %v49_v8  ;;  %v52_v12 = vld [vmem:[#allocation6 + $0x38] sm:$0xff]  ;;  %v53_v14 = vld [vmem:[#allocation6 + $0x40] sm:$0xff]  ;;  %v54_v15 = vld [vmem:[#allocation6 + $0x48] sm:$0xff]  ;;  %s284_s7 = scalar_lea.vmem %s147_s6, 128  ;;  %p289_p3 = scmp.lt.s32.totalorder %s147_s6, %s147_s6 }
  0x2a   :  { %210 = vmatpush3.bf16.msra.mxu0 %v209_v5  ;;  %v218_v13 = vpack.c.bf16 %v52_v12, %v51_v11  ;;  %v221_v16 = vpack.c.bf16 %v54_v15, %v53_v14  ;;  %v55_v17 = vld [vmem:[#allocation6 + $0x50] sm:$0xff]  ;;  %v56_v18 = vld [vmem:[#allocation6 + $0x58] sm:$0xff]  ;;  %v57_v20 = vld [vmem:[#allocation6 + $0x60] sm:$0xff]  ;;  %p285_p2 = scmp.ne.s32.totalorder %s147_s6, %s284_s7  ;;  %p290_p4 = scmp.lt.s32.totalorder %s284_s7, %s284_s7 }
  0x2b   :  { %211 = vmatprep.subr.bf16.mxu0 %v316_v0  ;;  %v224_v19 = vpack.c.bf16 %v56_v18, %v55_v17  ;;  %v58_v21 = vld [vmem:[#allocation6 + $0x68] sm:$0xff]  ;;  %v59_v23 = vld [vmem:[#allocation6 + $0x70] sm:$0xff]  ;;  %v60_v24 = vld [vmem:[#allocation6 + $0x78] sm:$0xff] }
  0x2c   :  { %v227_v22 = vpack.c.bf16 %v58_v21, %v57_v20  ;;  %v230_v25 = vpack.c.bf16 %v60_v24, %v59_v23  ;;  %v44_v26 = vld [vmem:[#allocation3] sm:$0xff]  ;;  %p291_p5 = por %p290_p4, %p289_p3 }
  0x2e   :  { %213 = vmatpush3.bf16.msra.mxu0 %v212_v7  ;;  %p292_p6 = pnand %p291_p5, %p285_p2 }
  0x2f   :  { %214 = vmatprep.subr.bf16.mxu0 %v316_v0 }
  0x32   :  { %216 = vmatpush3.bf16.msra.mxu0 %v215_v10 }
  0x33   :  { %217 = vmatprep.subr.bf16.mxu0 %v316_v0 }
  0x36   :  { %219 = vmatpush3.bf16.msra.mxu0 %v218_v13 }
  0x37   :  { %220 = vmatprep.subr.bf16.mxu0 %v316_v0 }
  0x3a   :  { %222 = vmatpush3.bf16.msra.mxu0 %v221_v16 }
  0x3b   :  { %223 = vmatprep.subr.bf16.mxu0 %v316_v0 }
  0x3e   :  { %225 = vmatpush3.bf16.msra.mxu0 %v224_v19 }
  0x3f   :  { %226 = vmatprep.subr.bf16.mxu0 %v316_v0 }
  0x42   :  { %228 = vmatpush3.bf16.msra.mxu0 %v227_v22 }
  0x43   :  { %229 = vmatprep.subr.bf16.mxu0 %v316_v0 }
  0x46   :  { %231 = vmatpush3.bf16.msra.mxu0 %v230_v25 }
  0x49   :  { %206 = vmatmul.mubr.f32.vlgmr.msra.gmra.mrb[0].mxu0 %v44_v26 }
 0x11c   :  { %v127_v27 = vpop.f32.mrb[0].mxu0 }
 0x11d   :  { %v137_v28 = vmul.f32 0.2, %v127_v27  ;;  %v207_v29 = vpop.f32.mrb[1].mxu0 }
 0x11f   :  { %v138_v30 = vmax.f32 %v127_v27, %v137_v28 }
 0x121   :  { %139 = vst [vmem:[#allocation8] sm:$0xff] %v138_v30 }
 0x122   :  { %295 = shalt.err (!%p292_p6)
}
 0x123   :  { %s296_s10 = scalar_lea.hbm %s380_s2, 128 }
 0x124   :  { %p297_p7 = scmp.ne.s32.totalorder %s380_s2, %s296_s10  ;;  %p300_p8 = scmp.lt.u32.totalorder %s296_s10, %s380_s2 }
 0x126   :  { %p302_p9 = pnand %p300_p8, %p297_p7 }
 0x128   :  { %305 = shalt.err (!%p302_p9)
}
 0x129   :  { %149 = dma.vmem_to_hbm [thread:$0]  %s147_s6, 128, %s380_s2, [#allocation5]  }
 0x12a   :  { %310 = dma.done.wait [#allocation5], 128  }
 0x12b   :  { %311 = vsyncadd [#allocation5], 4294967168 }
 0x12c   :  { %153 = vsyncpa [#allocation4], 1 }
 0x12d   :  { %154 = vsyncpa [#allocation7], 1 }
 0x12e   :  { %155 = vsyncpa [#allocation5], 1 }

</bundles_post_ra>
